<compile_context>
chip_gen: v6e
topology: v6e:2x2x1
jax: 0.10.0
libtpu: 0.0.40
codegen_flags: <defaults>
</compile_context>

<pallas_src>
import functools

import jax
import jax.numpy as jnp
from jax.experimental import pallas as pl
from jax.experimental.pallas import tpu as pltpu


def _eca_kernel(w_ref, x_ref, o_ref, ypad_ref, *, k, pad, inv_hw):
    # w_ref:    (k,)              conv weights, f32, SMEM
    # x_ref:    (Nb, C, HW)       feature-map slab, native dtype, VMEM
    # o_ref:    (Nb, C, HW)
    # ypad_ref: (Nb, C+2*pad, 1)  f32 VMEM scratch (zero-padded pooled vector)
    c = x_ref.shape[1]

    # 1) Global average pool over spatial positions. Only the pooled vector is
    #    kept in f32 -- the full (C, HW) tile is never upcast.
    y = jnp.sum(x_ref[...], axis=-1, keepdims=True, dtype=jnp.float32) * inv_hw

    # 2) k-tap channel conv with zero padding: place the pooled vector in the
    #    middle of a zero-padded scratch, then read k shifted windows and do
    #    scalar-weighted FMAs (VPU only).
    ypad_ref[...] = jnp.zeros_like(ypad_ref)
    ypad_ref[:, pl.ds(pad, c), :] = y
    conv = w_ref[0] * ypad_ref[:, pl.ds(0, c), :]
    for t in range(1, k):
        conv = conv + w_ref[t] * ypad_ref[:, pl.ds(t, c), :]

    # 3) Sigmoid -> channel attention; cast the tiny vector down once.
    att = jax.nn.sigmoid(conv).astype(o_ref.dtype)            # (Nb, C, 1)

    # 4) Scale in native dtype (broadcast over the HW / lane axis).
    o_ref[...] = x_ref[...] * att


def eca_forward(x, conv_w, *, batch_block=1):
    """x: (N, C, H, W); conv_w: (k,) weights of Conv1d(1, 1, k, bias=False)."""
    N, C, H, W = x.shape
    HW = H * W
    k = int(conv_w.shape[0])
    pad = (k - 1) // 2
    nb = batch_block
    assert N % nb == 0, "batch_block must divide N"
    x2 = x.reshape(N, C, HW)

    # Single-pass slab per grid step. Raise the scoped-VMEM limit only when the
    # double-buffered in+out slabs would not fit the 32 MiB default.
    itemsize = jnp.dtype(x.dtype).itemsize
    slab_bytes = nb * C * HW * itemsize
    vmem_need = 4 * slab_bytes + (1 << 20)      # 2x in + 2x out buffers + slack
    vmem_limit = None
    if vmem_need > (32 << 20):
        vmem_limit = min(vmem_need, 96 << 20)

    kernel = functools.partial(_eca_kernel, k=k, pad=pad, inv_hw=1.0 / HW)

    out = pl.pallas_call(
        kernel,
        out_shape=jax.ShapeDtypeStruct((N, C, HW), x.dtype),
        grid_spec=pltpu.PrefetchScalarGridSpec(
            num_scalar_prefetch=0,
            grid=(N // nb,),
            in_specs=[
                pl.BlockSpec(memory_space=pltpu.MemorySpace.SMEM),  # conv_w (k,)
                pl.BlockSpec((nb, C, HW), lambda n: (n, 0, 0)),
            ],
            out_specs=pl.BlockSpec((nb, C, HW), lambda n: (n, 0, 0)),
            scratch_shapes=[pltpu.VMEM((nb, C + 2 * pad, 1), jnp.float32)],
        ),
        compiler_params=pltpu.CompilerParams(
            dimension_semantics=("parallel",),
            vmem_limit_bytes=vmem_limit,
        ),
    )(conv_w.astype(jnp.float32), x2)
    return out.reshape(N, C, H, W)


def _eca_reference(x, conv_w):
    """Pure-JAX reference matching the PyTorch eca_layer forward."""
    k = conv_w.shape[0]
    pad = (k - 1) // 2
    y = jnp.mean(x, axis=(2, 3))                        # (N, C)
    y_pad = jnp.pad(y, ((0, 0), (pad, pad)))            # zero pad on channel axis
    conv = sum(conv_w[t] * y_pad[:, t:t + y.shape[1]] for t in range(k))
    att = jax.nn.sigmoid(conv)                          # (N, C)
    return x * att[:, :, None, None]


if __name__ == "__main__":
    key = jax.random.PRNGKey(0)
    kx, kw = jax.random.split(key)

    N, C, H, W = 2, 4, 16, 16
    k_size = 3

    x = jax.random.normal(kx, (N, C, H, W), dtype=jnp.float32)
    # Conv1d(1, 1, k_size, bias=False) -> k_size weights.
    conv_w = jax.random.uniform(kw, (k_size,), dtype=jnp.float32,
                                minval=-1.0, maxval=1.0)

    out = eca_forward(x, conv_w)
    out = jax.block_until_ready(out)

    ref = _eca_reference(x, conv_w)
    assert out.shape == x.shape
    assert jnp.allclose(out, ref, atol=1e-5, rtol=1e-5), "mismatch vs reference"

    print("KERNEL_OK")
</pallas_src>

<mosaic_0001>
module attributes {stable_mosaic.version = 11 : i64} {
  func.func @_eca_kernel(%arg0: i32, %arg1: memref<3xf32, #tpu.memory_space<smem>>, %arg2: memref<1x4x256xf32, #tpu.memory_space<vmem>>, %arg3: memref<1x4x256xf32, #tpu.memory_space<vmem>>, %arg4: memref<1x6x1xf32, #tpu.memory_space<vmem>>) attributes {dimension_semantics = [#tpu.dimension_semantics<parallel>], iteration_bounds = array<i64: 2>, scalar_prefetch = 0 : i64, scratch_operands = 1 : i64, tpu.core_type = #tpu.core_type<tc>, window_params = [{transform_indices = @transform_0, window_bounds = array<i64: 3>}, {transform_indices = @transform_1, window_bounds = array<i64: 1, 4, 256>}, {transform_indices = @transform_2, window_bounds = array<i64: 1, 4, 256>}]} {
    %c0 = arith.constant 0 : index
    %c0_0 = arith.constant 0 : index
    %c0_1 = arith.constant 0 : index
    %0 = vector.load %arg2[%c0, %c0_0, %c0_1] : memref<1x4x256xf32, #tpu.memory_space<vmem>>, vector<1x4x256xf32>
    %cst = arith.constant dense<0.000000e+00> : vector<1x4xf32>
    %1 = vector.multi_reduction <add>, %0, %cst [2] : vector<1x4x256xf32> to vector<1x4xf32>
    %2 = vector.shape_cast %1 : vector<1x4xf32> to vector<1x4x1xf32>
    %cst_2 = arith.constant 3.906250e-03 : f32
    %3 = vector.broadcast %cst_2 : f32 to vector<1x4x1xf32>
    %4 = arith.mulf %2, %3 : vector<1x4x1xf32>
    %cst_3 = arith.constant 0.000000e+00 : f32
    %5 = vector.broadcast %cst_3 : f32 to vector<1x6x1xf32>
    %c0_4 = arith.constant 0 : index
    %c0_5 = arith.constant 0 : index
    %c0_6 = arith.constant 0 : index
    %6 = vector.load %arg4[%c0_4, %c0_5, %c0_6] : memref<1x6x1xf32, #tpu.memory_space<vmem>>, vector<1x6x1xf32>
    tpu.vector_store %arg4[%c0_4, %c0_5, %c0_6], %5 {strides = array<i32>} : memref<1x6x1xf32, #tpu.memory_space<vmem>>, vector<1x6x1xf32>,
    %c0_7 = arith.constant 0 : index
    %c1 = arith.constant 1 : index
    %c0_8 = arith.constant 0 : index
    %7 = vector.load %arg4[%c0_7, %c1, %c0_8] : memref<1x6x1xf32, #tpu.memory_space<vmem>>, vector<1x4x1xf32>
    tpu.vector_store %arg4[%c0_7, %c1, %c0_8], %4 {strides = array<i32>} : memref<1x6x1xf32, #tpu.memory_space<vmem>>, vector<1x4x1xf32>,
    %c0_9 = arith.constant 0 : index
    %8 = memref.load %arg1[%c0_9] : memref<3xf32, #tpu.memory_space<smem>>
    %c0_10 = arith.constant 0 : index
    %c0_11 = arith.constant 0 : index
    %c0_12 = arith.constant 0 : index
    %9 = vector.load %arg4[%c0_10, %c0_11, %c0_12] : memref<1x6x1xf32, #tpu.memory_space<vmem>>, vector<1x4x1xf32>
    %10 = vector.broadcast %8 : f32 to vector<1x4x1xf32>
    %11 = arith.mulf %10, %9 : vector<1x4x1xf32>
    %c1_13 = arith.constant 1 : index
    %12 = memref.load %arg1[%c1_13] : memref<3xf32, #tpu.memory_space<smem>>
    %c0_14 = arith.constant 0 : index
    %c1_15 = arith.constant 1 : index
    %c0_16 = arith.constant 0 : index
    %13 = vector.load %arg4[%c0_14, %c1_15, %c0_16] : memref<1x6x1xf32, #tpu.memory_space<vmem>>, vector<1x4x1xf32>
    %14 = vector.broadcast %12 : f32 to vector<1x4x1xf32>
    %15 = arith.mulf %14, %13 : vector<1x4x1xf32>
    %16 = arith.addf %11, %15 : vector<1x4x1xf32>
    %c2 = arith.constant 2 : index
    %17 = memref.load %arg1[%c2] : memref<3xf32, #tpu.memory_space<smem>>
    %c0_17 = arith.constant 0 : index
    %c2_18 = arith.constant 2 : index
    %c0_19 = arith.constant 0 : index
    %18 = vector.load %arg4[%c0_17, %c2_18, %c0_19] : memref<1x6x1xf32, #tpu.memory_space<vmem>>, vector<1x4x1xf32>
    %19 = vector.broadcast %17 : f32 to vector<1x4x1xf32>
    %20 = arith.mulf %19, %18 : vector<1x4x1xf32>
    %21 = arith.addf %16, %20 : vector<1x4x1xf32>
    %22 = arith.negf %21 : vector<1x4x1xf32>
    %23 = math.exp %22 : vector<1x4x1xf32>
    %cst_20 = arith.constant 1.000000e+00 : f32
    %24 = vector.broadcast %cst_20 : f32 to vector<1x4x1xf32>
    %25 = arith.addf %24, %23 : vector<1x4x1xf32>
    %26 = arith.divf %24, %25 : vector<1x4x1xf32>
    %c0_21 = arith.constant 0 : index
    %c0_22 = arith.constant 0 : index
    %c0_23 = arith.constant 0 : index
    %27 = vector.load %arg2[%c0_21, %c0_22, %c0_23] : memref<1x4x256xf32, #tpu.memory_space<vmem>>, vector<1x4x256xf32>
    %28 = vector.broadcast %26 : vector<1x4x1xf32> to vector<1x4x256xf32>
    %29 = arith.mulf %27, %28 : vector<1x4x256xf32>
    %c0_24 = arith.constant 0 : index
    %c0_25 = arith.constant 0 : index
    %c0_26 = arith.constant 0 : index
    %30 = vector.load %arg3[%c0_24, %c0_25, %c0_26] : memref<1x4x256xf32, #tpu.memory_space<vmem>>, vector<1x4x256xf32>
    tpu.vector_store %arg3[%c0_24, %c0_25, %c0_26], %29 {strides = array<i32>} : memref<1x4x256xf32, #tpu.memory_space<vmem>>, vector<1x4x256xf32>,
    return
  }
  func.func @transform_0(%arg0: i32) -> i32 {
    %c0_i32 = arith.constant 0 : i32
    %c0_i32_0 = arith.constant 0 : i32
    return %c0_i32 : i32
  }
  func.func @transform_1(%arg0: i32) -> (i32, i32, i32) {
    %c0_i32 = arith.constant 0 : i32
    %c0_i32_0 = arith.constant 0 : i32
    %c0_i32_1 = arith.constant 0 : i32
    return %arg0, %c0_i32, %c0_i32_0 : i32, i32, i32
  }
  func.func @transform_2(%arg0: i32) -> (i32, i32, i32) {
    %c0_i32 = arith.constant 0 : i32
    %c0_i32_0 = arith.constant 0 : i32
    %c0_i32_1 = arith.constant 0 : i32
    return %arg0, %c0_i32, %c0_i32_0 : i32, i32, i32
  }
}

</mosaic_0001>

<bundles_post_ra>
// kernel: tpu_custom_call.1
= control target key start
LH: loop header
LB: loop body
LE: loop exit
PB: predicated region body
PF: predicated region fallthrough
CT: control target
= control target key end

     0   :  { %7 = vsyncpa [#allocation6], 0  ;;  %s686_s0 = inlined_call_operand.hbm [shape: f32[3], index: 0, kind: input, shape index: {}]   ;;  %s687_s1 = inlined_call_operand.hbm [shape: f32[2,4,256], index: 1, kind: input, shape index: {}]   ;;  %s688_s2 = inlined_call_operand.hbm [shape: f32[2,4,256], index: 2, kind: output, shape index: {}]  }
   0x1   :  { %8 = vsyncpa [#allocation4], 0 }
   0x2   :  { %10 = vsyncpa [#allocation4 + $0x1], 0 }
   0x3   :  { %11 = vsyncpa [#allocation5], 0 }
   0x4   :  { %13 = vsyncpa [#allocation5 + $0x1], 0  ;;  %s536_s9 = smov 0   ;;  %s538_s10 = smov 0  }
   0x5   :  { %s540_s11 = smov 0   ;;  %s542_s12 = smov 0  }
   0x6 LB: > { %s557_s13 = sadd.s32 4294967295, %s513_s12   ;;  %s319_s14 = sadd.s32 4294967294, %s513_s12   ;;  %s513_s12 = sphi %s542_s12, %s708_s12   ;;  %s509_s11 = sphi %s540_s11, %s707_s11   ;;  %s505_s10 = sphi %s538_s10, %s706_s10   ;;  %s501_s9 = sphi %s536_s9, %s705_s9  }
   0x7   : > { %p60_p0 = scmp.ne.s32.totalorder %s505_s10, %s501_s9  ;;  %p689_p1 = scmp.eq.s32.totalorder %s557_s13, 0 }
   0x8   : > { %p84_p2 = scmp.eq.s32.totalorder %s557_s13, 1  ;;  %p90_p3 = scmp.eq.s32.totalorder %s319_s14, 1 }
   0x9   : > { %p566_p4 = por %p689_p1, %p60_p0  ;;  %p320_p5 = scmp.ge.s32.totalorder %s513_s12, 1 }
   0xa   : > { %p571_p6 = por %p90_p3, %p60_p0  ;;  %p97_p7 = scmp.lt.s32.totalorder %s513_s12, 3 }
   0xb   : > { %s693_s15 = scalar_select %p566_p4, 1, 0 }
   0xc   : > { %s694_s16 = scalar_select %p571_p6, 1, 0 }
   0xd   : > { %p576_p8 = pnand %p320_p5, %p97_p7  ;;  %s582_s18 = sadd.s32 1, %s513_s12  }
   0xe   : > { %s44_s19 = ssub.s32 %s513_s12, %s582_s18  ;;  %s47_s20 = sadd.s32 1, %s509_s11 }
   0xf   : > { %s695_s17 = scalar_select %p576_p8, 1, 0 }
  0x10   : > { %p348_p10 = pneg %p576_p8  ;;  %p45_p12 = scmp.eq.s32.totalorder %s44_s19, 0 }
  0x11   : > { %p54_p13 = scmp.ne.s32.totalorder %s509_s11, %s505_s10  ;;  %p55_p0 = scmp.eq.s32.totalorder %s513_s12, 0 }
  0x12   : > { %p349_p11 = pnand %p348_p10, %p689_p1  ;;  %p361_p3 = scmp.lt.s32.totalorder %s513_s12, 2 }
  0x13   : > { %s515_s21 = smov [#allocation3]   ;;  %p56_p5 = por %p55_p0, %p54_p13 }
  0x14   : > { %351 = dma.hbm_to_smem (!%p349_p11), %s686_s0, 16, %s515_s21, [#allocation6]  }
  0x15   : > { %s599_s24 = scalar_select %p45_p12, %s509_s11, %s47_s20  }
  0x16   : > { %p603_p7 = por %p84_p2, %p54_p13  ;;  %s119_s26 = sand.u32 1, %s509_s11  }
  0x17   : > { %s338_s27 = sshll.u32 %s513_s12, 7  ;;  %s323_s28 = sshll.u32 %s119_s26, 3 }
  0x18   : > { %s696_s25 = scalar_select %p603_p7, 1, 0 }
  0x19   : > { %s612_s3 = scalar_lea.hbm %s687_s1, %s338_s27  ;;  %s123_s4 = scalar_lea.vmem [#allocation7], %s323_s28 }
  0x1a   : > { %s131_s5 = sshll.u32 %s123_s4, 4  ;;  %p614_p10 = pnand %p361_p3, %p56_p5  ;;  %s132_s5 = int_to_ptr.vmem [resolvable:$true] %s131_s5 }
  0x1b   : > { %s120_s7 = scalar_lea.sflag [#allocation4], %s119_s26  ;;  %s417_s8 = scalar_lea.hbm %s612_s3, 128 }
  0x1c   : > { %p418_p2 = scmp.ne.s32.totalorder %s612_s3, %s417_s8  ;;  %p419_p11 = pneg %p614_p10 }
  0x1d   : > { %s422_s20 = scalar_lea.hbm %s687_s1, 256  ;;  %p423_p0 = scmp.lt.s32.totalorder %s612_s3, %s687_s1 }
  0x1e   : > { %p420_p12 = pnand %p419_p11, %p418_p2  ;;  %p424_p3 = scmp.lt.s32.totalorder %s422_s20, %s417_s8 }
  0x20   : > { %p421_p13 = pneg %p420_p12  ;;  %p425_p5 = por %p424_p3, %p423_p0 }
  0x22   : > { %p426_p9 = pnand %p425_p5, %p421_p13 }
  0x24   : > { %429 = shalt.err (!%p426_p9)
}
  0x25   : > { %s430_s23 = scalar_lea.vmem %s132_s5, 128  ;;  %s516_s26 = smov [#allocation7]  }
  0x26   : > { %p431_p1 = scmp.ne.s32.totalorder %s132_s5, %s430_s23  ;;  %s435_s27 = sshll.u32 %s516_s26, 4  ;;  %s436_s27 = int_to_ptr.vmem [resolvable:$false] %s435_s27 }
  0x27   : > { %s437_s28 = scalar_lea.vmem %s436_s27, 256  ;;  %p438_p2 = scmp.lt.s32.totalorder %s132_s5, %s436_s27 }
  0x28   : > { %p433_p6 = pnand %p431_p1, %p419_p11  ;;  %p439_p12 = scmp.lt.s32.totalorder %s437_s28, %s430_s23 }
  0x2a   : > { %p434_p7 = pneg %p433_p6  ;;  %p440_p4 = por %p439_p12, %p438_p2 }
  0x2c   : > { %p441_p8 = pnand %p440_p4, %p434_p7 }
  0x2e   : > { %444 = shalt.err (!%p441_p8)
}
  0x2f   : > { %355 = dma.hbm_to_vmem [thread:$0]  (!%p614_p10), %s612_s3, 128, %s132_s5, %s120_s7  }
  0x30   : > { %p698_p13 = scmp.ne.s32.totalorder %s695_s17, 0 }
  0x31   : > { %p699_p9 = scmp.eq.s32.totalorder (!%p698_p13), %s557_s13, 0 }
  0x32   : > { %140 = sbr.rel (%p698_p13) target bundleno = 396 (0x18c), region = 28 }
  0x37   : > { %488 = dma.done.wait (%p699_p9), [#allocation6], 16   ;;  %p700_p1 = pmov %p699_p9 }
  0x38   : > { %s639_s29 = sand.u32 1, %s505_s10   ;;  %p701_p4 = scmp.ne.s32.totalorder %s693_s15, 0 }
  0x39   : > { %490 = vsyncadd (%p700_p1), [#allocation6], 4294967280  ;;  %s328_s30 = sshll.u32 %s639_s29, 3  ;;  %s147_s4 = scalar_lea.sflag [#allocation4], %s639_s29 }
  0x3a   : > { %s150_s3 = scalar_lea.vmem [#allocation7], %s328_s30 }
  0x3b   : > { %492 = dma.done.wait (%p701_p4), %s147_s4, 128  }
  0x3c   : > { %494 = vsyncadd (%p701_p4), %s147_s4, 4294967168 }
  0x3d   : > { %155 = sfence }
  0x3e   : > { %v172_v0 = vld [vmem:[%s150_s3] sm:$0xff]  ;;  %vm176_vm0 = vcmask 1043456   ;;  %vm183_vm1 = vcmask 5120   ;;  %v517_v3 = vmov 0.0   ;;  %v518_v6 = vmov 0   ;;  %s187_s17 = sld [smem:[#allocation3]] }
  0x3f   : > { %v174_v1 = vcombine.high %v172_v0, %v172_v0  ;;  %v177_v2 = vsel %vm176_vm0, %v172_v0, 0.0  ;;  %184 = vst.msk [vmem:[#allocation2] sm:$0x3f] %vm183_vm1, %v517_v3  ;;  %400 = vset.pattern.permute.xlu0 %v518_v6  ;;  %vm185_vm2 = vcmask 3072   ;;  %s330_s5 = sld [smem:[#allocation3 + $0x1]]  ;;  %v215_v26 = vlaneseq  ;;  %s339_s6 = sshll.u32 %s557_s13, 7 }
  0x40   : > { %s331_s15 = sld [smem:[#allocation3 + $0x2]]  ;;  %v519_v24 = vmov 839922192   ;;  %s171_s7 = scalar_lea.vmem [#allocation8], %s328_s30 }
  0x41   : > { %v178_v4 = vsel %vm176_vm0, %v174_v1, 0.0  ;;  %v213_v25 = vunpack.c.l.s4 %v519_v24  ;;  %v216_v28 = vshrl.u32 %v215_v26, 7  ;;  %s237_s8 = sshll.u32 %s171_s7, 4  ;;  %s235_s20 = scalar_lea.hbm %s688_s2, %s339_s6  ;;  %s238_s8 = int_to_ptr.vmem [resolvable:$true] %s237_s8 }
  0x42   : > { %v179_v5 = vadd.f32 %v178_v4, %v177_v2  ;;  %s223_s21 = scalar_lea.sflag [#allocation5], %s639_s29  ;;  %s445_s22 = scalar_lea.vmem %s238_s8, 128 }
  0x43   : > { %v214_v27 = vunpack.c.0.s8 %v213_v25  ;;  %p446_p6 = scmp.ne.s32.totalorder %s238_s8, %s445_s22  ;;  %p702_p8 = scmp.ne.s32.totalorder %s696_s25, 0 }
  0x44   : > { %180 = vadd.xlane.f32.xlu0 %v179_v5  ;;  %v189_v9 = vstv %s187_s17  ;;  %s520_s23 = smov [#allocation8]  }
  0x45   : > { %v193_v10 = vstv %s330_s5  ;;  %v217_v29 = vsub.s32 %v214_v27, %v216_v28  ;;  %p447_p7 = pnand %p446_p6, %p702_p8  ;;  %s449_s26 = sshll.u32 %s520_s23, 4  ;;  %s450_s26 = int_to_ptr.vmem [resolvable:$false] %s449_s26 }
  0x46   : > { %v198_v14 = vstv %s331_s15  ;;  %s451_s13 = scalar_lea.vmem %s450_s26, 256  ;;  %p452_p11 = scmp.lt.s32.totalorder %s238_s8, %s450_s26 }
  0x47   : > { %p448_p10 = pneg %p447_p7  ;;  %p453_p0 = scmp.lt.s32.totalorder %s451_s13, %s445_s22 }
  0x49   : > { %p454_p3 = por %p453_p0, %p452_p11 }
  0x4b   : > { %p455_p5 = pnand %p454_p3, %p448_p10 }
  0xcd   : > { %v181_v7 = vpop.xlane.xlu0 %180 }
  0xce   : > { %v182_v8 = vmul.f32 0.00390625, %v181_v7 }
  0xd0   : > { %186 = vst.msk [vmem:[#allocation2 + $0x1] sm:$0xf] %vm185_vm2, %v182_v8 }
  0xd7   : > { %v188_v11 = vld [vmem:[#allocation2] sm:$0xf] }
  0xd8   : > { %v192_v12 = vld [vmem:[#allocation2 + $0x1] sm:$0xf]  ;;  %v190_v15 = vmul.f32 %v189_v9, %v188_v11 }
  0xd9   : > { %v197_v13 = vld [vmem:[#allocation2 + $0x2] sm:$0xf]  ;;  %v194_v16 = vmul.f32 %v193_v10, %v192_v12 }
  0xda   : > { %v199_v18 = vmul.f32 %v198_v14, %v197_v13 }
  0xdb   : > { %v195_v17 = vadd.f32 %v194_v16, %v190_v15 }
  0xdd   : > { %v200_v19 = vadd.f32 %v199_v18, %v195_v17 }
  0xdf   : > { %v332_v20 = vmul.f32 -1.442695, %v200_v19 }
  0xe1   : > { %402 = vpow2.f32 %v332_v20 }
  0xee   : > { %v403_v21 = vpop.eup %402 }
  0xef   : > { %v204_v22 = vadd.f32 1.0, %v403_v21 }
  0xf1   : > { %404 = vrcp.f32 %v204_v22 }
  0xfe   : > { %v405_v23 = vpop.eup %404 }
  0xff   : > { %210 = vperm.xlu0 %400, %v405_v23  }
 0x17a   : > { %v211_v30 = vpop.permute.xlu0 %210 }
 0x17b   : > { %v218_v31 = vrot.slane %v211_v30, %v217_v29 }
 0x17d   : > { %v220_v32 = vmul.f32 %v218_v31, %v172_v0 }
 0x17f   : > { %221 = vst [vmem:[%s171_s7] sm:$0xff] %v220_v32 }
 0x180   : > { %458 = shalt.err (!%p455_p5)
}
 0x181   : > { %s459_s27 = scalar_lea.hbm %s235_s20, 128  ;;  %s463_s30 = scalar_lea.hbm %s688_s2, 256 }
 0x182   : > { %p460_p2 = scmp.ne.s32.totalorder %s235_s20, %s459_s27  ;;  %p464_p9 = scmp.lt.s32.totalorder %s235_s20, %s688_s2 }
 0x183   : > { %p465_p1 = scmp.lt.s32.totalorder %s463_s30, %s459_s27 }
 0x184   : > { %p461_p12 = pnand %p460_p2, %p702_p8 }
 0x185   : > { %p466_p4 = por %p465_p1, %p464_p9 }
 0x186   : > { %p462_p13 = pneg %p461_p12 }
 0x188   : > { %p467_p6 = pnand %p466_p4, %p462_p13 }
 0x18a   : > { %470 = shalt.err (!%p467_p6)
}
 0x18b   : > { %346 = dma.vmem_to_hbm [thread:$0]  (%p702_p8), %s238_s8, 128, %s235_s20, %s223_s21  }
 0x18c PF: > { %s249_s17 = sand.u32 1, %s501_s9   ;;  %p703_p7 = scmp.ne.s32.totalorder %s694_s16, 0 }
 0x18d   : > { %p704_p10 = scmp.ge.s32.totalorder %s513_s12, 2  ;;  %s250_s5 = scalar_lea.sflag [#allocation5], %s249_s17 }
 0x18f   : > { %p357_p11 = pnand %p704_p10, %p703_p7 }
 0x191   : > { %p358_p0 = pneg %p357_p11 }
 0x193   : > { %496 = dma.done.wait (%p358_p0), %s250_s5, 128  }
 0x194   : > { %498 = vsyncadd (%p358_p0), %s250_s5, 4294967168  ;;  %p16_p3 = scmp.ge.s32.totalorder %s582_s18, 4   ;;  %s705_s9 = smov %s505_s10 }
 0x195   : > { %s706_s10 = smov %s509_s11  ;;  %s707_s11 = smov %s599_s24 }
 0x196   : > { %s708_s12 = smov %s582_s18  ;;  %18 = sbr.rel (!%p16_p3) target bundleno = 6 (0x6), region = 78 }
 0x19b   :  { %255 = vsyncpa [#allocation4], 1 }
 0x19c   :  { %257 = vsyncpa [#allocation4 + $0x1], 1 }
 0x19d   :  { %258 = vsyncpa [#allocation5], 1 }
 0x19e   :  { %260 = vsyncpa [#allocation5 + $0x1], 1 }
 0x19f   :  { %261 = vsyncpa [#allocation6], 1 }
 0x1a0   :  { %263 = vsyncpa [#allocation6 + $0x1], 1 }

</bundles_post_ra>
